<compile_context>
chip_gen: v6e
topology: v6e:2x2x1
jax: 0.10.0
libtpu: 0.0.40
codegen_flags: <defaults>
</compile_context>

<pallas_src>
import jax
import jax.numpy as jnp
from jax.experimental import pallas as pl
from jax.experimental.pallas import tpu as pltpu


# TODO(synk): torch nn.GELU() is the exact erf-based GELU; here we use the tanh
# approximation (guaranteed Mosaic lowering; max abs diff ~1e-3).
def _gelu(x):
    return 0.5 * x * (1.0 + jnp.tanh(0.7978845608028654 * (x + 0.044715 * x * x * x)))


# ----------------------------------------------------------------------------
# Kernel 1: s = mean(Linear(GELU(t)))  (tiny; single VMEM block, no grid)
# ----------------------------------------------------------------------------
def _mlp_mean_kernel(t_ref, w_ref, b_ref, s_ref):
    h = _gelu(t_ref[...].astype(jnp.float32))             # (B, D)
    y = jnp.sum(h * w_ref[...], axis=-1, keepdims=True)   # (B, 1) == GELU(t) @ W.T
    y = y + b_ref[...]                                     # + bias
    s_ref[...] = jnp.mean(y, axis=0, keepdims=True)        # (1, 1) == t.mean()


def pallas_mlp_mean(t, w, b):
    """w: (1, D) torch nn.Linear(D, 1).weight layout; b: (1,). Returns (1,1) f32."""
    _, D = t.shape
    return pl.pallas_call(
        _mlp_mean_kernel,
        out_shape=jax.ShapeDtypeStruct((1, 1), jnp.float32),
        in_specs=[pl.BlockSpec(memory_space=pltpu.MemorySpace.VMEM)] * 3,
        out_specs=pl.BlockSpec(memory_space=pltpu.MemorySpace.VMEM),
    )(t.astype(jnp.float32), w.reshape(1, D).astype(jnp.float32),
      b.reshape(1, 1).astype(jnp.float32))


# ----------------------------------------------------------------------------
# Kernel 2: out = feat + s * noise   (tiled, lane-dense, megacore-parallel)
# ----------------------------------------------------------------------------
def _inject_kernel(s_ref, feat_ref, noise_ref, out_ref):
    # feat block: (1, C, TN); noise block: (1, 1, TN) -> broadcast over channels.
    out_ref[...] = feat_ref[...] + s_ref[...] * noise_ref[...]


def _pick_spatial_tile(hw):
    for tn in (2048, 1024, 512, 256, 128):
        if hw % tn == 0:
            return tn
    return hw  # full-extent block is allowed when HW is not a multiple of 128


def pallas_noise_inject(feat3, noise3, s):
    """feat3: (B, C, HW), noise3: (B, 1, HW), s: (1, 1) -> (B, C, HW)."""
    B, C, HW = feat3.shape
    TN = _pick_spatial_tile(HW)
    grid = (B, HW // TN)
    itemsize = jnp.dtype(feat3.dtype).itemsize
    bytes_accessed = int(2 * feat3.size * itemsize + noise3.size * itemsize + 4)
    return pl.pallas_call(
        _inject_kernel,
        out_shape=jax.ShapeDtypeStruct((B, C, HW), feat3.dtype),
        grid=grid,
        in_specs=[
            pl.BlockSpec((1, 1, 1), lambda b, j: (0, 0, 0)),    # scalar scale (resident)
            pl.BlockSpec((1, C, TN), lambda b, j: (b, 0, j)),   # feat tile
            pl.BlockSpec((1, 1, TN), lambda b, j: (b, 0, j)),   # noise tile (bcast over C)
        ],
        out_specs=pl.BlockSpec((1, C, TN), lambda b, j: (b, 0, j)),
        compiler_params=pltpu.CompilerParams(
            dimension_semantics=("parallel", "parallel")),
        cost_estimate=pl.CostEstimate(
            flops=2 * B * C * HW, transcendentals=0,
            bytes_accessed=bytes_accessed),
    )(s.reshape(1, 1, 1).astype(feat3.dtype), feat3, noise3)


# ----------------------------------------------------------------------------
# Forward pass (matches torch NoiseInjection.forward semantics)
# ----------------------------------------------------------------------------
def noise_injection_forward(params, feat, t, noise=None, key=None):
    """feat: (B, C, H, W) NCHW; t: (B, time_emb_dim)."""
    B, C, H, W = feat.shape
    if noise is None:
        # torch.randn(batch, 1, H, W) equivalent (fresh standard-normal noise).
        noise = jax.random.normal(key, (B, 1, H, W), feat.dtype)
    s = pallas_mlp_mean(t, params["w"], params["b"])                 # (1, 1)
    out = pallas_noise_inject(feat.reshape(B, C, H * W),             # free reshape
                              noise.reshape(B, 1, H * W), s)
    return out.reshape(B, C, H, W)


# ----------------------------------------------------------------------------
if __name__ == "__main__":
    B, C, H, W = 2, 4, 16, 16
    time_emb_dim = 32

    key = jax.random.PRNGKey(0)
    kf, kt, kw, kb, kn = jax.random.split(key, 5)
    feat = jax.random.normal(kf, (B, C, H, W), jnp.float32)
    t = jax.random.normal(kt, (B, time_emb_dim), jnp.float32)
    params = {
        "w": 0.1 * jax.random.normal(kw, (1, time_emb_dim), jnp.float32),  # Linear(D,1).weight
        "b": 0.1 * jax.random.normal(kb, (1,), jnp.float32),               # Linear(D,1).bias
    }
    noise = jax.random.normal(kn, (B, 1, H, W), jnp.float32)               # torch.randn(B,1,H,W)

    fwd = jax.jit(noise_injection_forward)
    out = fwd(params, feat, t, noise)
    jax.block_until_ready(out)
    assert out.shape == (B, C, H, W)

    # plain-JAX reference (same tanh-GELU) for a numerical sanity check
    s_ref = jnp.mean(_gelu(t) @ params["w"].T + params["b"])
    ref = feat + s_ref * noise
    assert jnp.allclose(out, ref, atol=1e-5, rtol=1e-5), float(jnp.max(jnp.abs(out - ref)))

    print("KERNEL_OK")
</pallas_src>

<mosaic_0001>
module attributes {stable_mosaic.version = 11 : i64} {
  func.func @_mlp_mean_kernel(%arg0: memref<2x32xf32, #tpu.memory_space<vmem>>, %arg1: memref<1x32xf32, #tpu.memory_space<vmem>>, %arg2: memref<1x1xf32, #tpu.memory_space<vmem>>, %arg3: memref<1x1xf32, #tpu.memory_space<vmem>>) attributes {dimension_semantics = [], scalar_prefetch = 0 : i64, scratch_operands = 0 : i64, tpu.core_type = #tpu.core_type<tc>} {
    %c0 = arith.constant 0 : index
    %c0_0 = arith.constant 0 : index
    %0 = vector.load %arg0[%c0, %c0_0] : memref<2x32xf32, #tpu.memory_space<vmem>>, vector<2x32xf32>
    %cst = arith.constant 5.000000e-01 : f32
    %1 = vector.broadcast %cst : f32 to vector<2x32xf32>
    %2 = arith.mulf %1, %0 : vector<2x32xf32>
    %cst_1 = arith.constant 4.471500e-02 : f32
    %3 = vector.broadcast %cst_1 : f32 to vector<2x32xf32>
    %4 = arith.mulf %3, %0 : vector<2x32xf32>
    %5 = arith.mulf %4, %0 : vector<2x32xf32>
    %6 = arith.mulf %5, %0 : vector<2x32xf32>
    %7 = arith.addf %0, %6 : vector<2x32xf32>
    %cst_2 = arith.constant 0.797884583 : f32
    %8 = vector.broadcast %cst_2 : f32 to vector<2x32xf32>
    %9 = arith.mulf %8, %7 : vector<2x32xf32>
    %10 = math.tanh %9 : vector<2x32xf32>
    %cst_3 = arith.constant 1.000000e+00 : f32
    %11 = vector.broadcast %cst_3 : f32 to vector<2x32xf32>
    %12 = arith.addf %11, %10 : vector<2x32xf32>
    %13 = arith.mulf %2, %12 : vector<2x32xf32>
    %c0_4 = arith.constant 0 : index
    %c0_5 = arith.constant 0 : index
    %14 = vector.load %arg1[%c0_4, %c0_5] : memref<1x32xf32, #tpu.memory_space<vmem>>, vector<1x32xf32>
    %15 = vector.broadcast %14 : vector<1x32xf32> to vector<2x32xf32>
    %16 = arith.mulf %13, %15 : vector<2x32xf32>
    %cst_6 = arith.constant dense<0.000000e+00> : vector<2xf32>
    %17 = vector.multi_reduction <add>, %16, %cst_6 [1] : vector<2x32xf32> to vector<2xf32>
    %18 = vector.shape_cast %17 : vector<2xf32> to vector<2x1xf32>
    %c0_7 = arith.constant 0 : index
    %c0_8 = arith.constant 0 : index
    %19 = vector.load %arg2[%c0_7, %c0_8] : memref<1x1xf32, #tpu.memory_space<vmem>>, vector<1x1xf32>
    %20 = vector.broadcast %19 : vector<1x1xf32> to vector<2x1xf32>
    %21 = arith.addf %18, %20 : vector<2x1xf32>
    %cst_9 = arith.constant dense<0.000000e+00> : vector<1xf32>
    %22 = vector.multi_reduction <add>, %21, %cst_9 [0] : vector<2x1xf32> to vector<1xf32>
    %23 = vector.shape_cast %22 : vector<1xf32> to vector<1x1xf32>
    %cst_10 = arith.constant 2.000000e+00 : f32
    %24 = vector.broadcast %cst_10 : f32 to vector<1x1xf32>
    %25 = arith.divf %23, %24 : vector<1x1xf32>
    %c0_11 = arith.constant 0 : index
    %c0_12 = arith.constant 0 : index
    %26 = vector.load %arg3[%c0_11, %c0_12] : memref<1x1xf32, #tpu.memory_space<vmem>>, vector<1x1xf32>
    tpu.vector_store %arg3[%c0_11, %c0_12], %25 {strides = array<i32>} : memref<1x1xf32, #tpu.memory_space<vmem>>, vector<1x1xf32>,
    return
  }
}

module attributes {stable_mosaic.version = 11 : i64} {
  func.func @_inject_kernel(%arg0: i32, %arg1: i32, %arg2: memref<1x1x1xf32, #tpu.memory_space<vmem>>, %arg3: memref<1x4x256xf32, #tpu.memory_space<vmem>>, %arg4: memref<1x1x256xf32, #tpu.memory_space<vmem>>, %arg5: memref<1x4x256xf32, #tpu.memory_space<vmem>>) attributes {dimension_semantics = [#tpu.dimension_semantics<parallel>, #tpu.dimension_semantics<parallel>], iteration_bounds = array<i64: 2, 1>, scalar_prefetch = 0 : i64, scratch_operands = 0 : i64, tpu.core_type = #tpu.core_type<tc>, window_params = [{pipeline_mode = #tpu.pipeline_mode<synchronous>, transform_indices = @transform_0, window_bounds = array<i64: 1, 1, 1>}, {transform_indices = @transform_1, window_bounds = array<i64: 1, 4, 256>}, {transform_indices = @transform_2, window_bounds = array<i64: 1, 1, 256>}, {transform_indices = @transform_3, window_bounds = array<i64: 1, 4, 256>}]} {
    %c0 = arith.constant 0 : index
    %c0_0 = arith.constant 0 : index
    %c0_1 = arith.constant 0 : index
    %0 = vector.load %arg3[%c0, %c0_0, %c0_1] : memref<1x4x256xf32, #tpu.memory_space<vmem>>, vector<1x4x256xf32>
    %c0_2 = arith.constant 0 : index
    %c0_3 = arith.constant 0 : index
    %c0_4 = arith.constant 0 : index
    %1 = vector.load %arg2[%c0_2, %c0_3, %c0_4] : memref<1x1x1xf32, #tpu.memory_space<vmem>>, vector<1x1x1xf32>
    %c0_5 = arith.constant 0 : index
    %c0_6 = arith.constant 0 : index
    %c0_7 = arith.constant 0 : index
    %2 = vector.load %arg4[%c0_5, %c0_6, %c0_7] : memref<1x1x256xf32, #tpu.memory_space<vmem>>, vector<1x1x256xf32>
    %3 = vector.broadcast %1 : vector<1x1x1xf32> to vector<1x1x256xf32>
    %4 = arith.mulf %3, %2 : vector<1x1x256xf32>
    %5 = vector.broadcast %4 : vector<1x1x256xf32> to vector<1x4x256xf32>
    %6 = arith.addf %0, %5 : vector<1x4x256xf32>
    %c0_8 = arith.constant 0 : index
    %c0_9 = arith.constant 0 : index
    %c0_10 = arith.constant 0 : index
    %7 = vector.load %arg5[%c0_8, %c0_9, %c0_10] : memref<1x4x256xf32, #tpu.memory_space<vmem>>, vector<1x4x256xf32>
    tpu.vector_store %arg5[%c0_8, %c0_9, %c0_10], %6 {strides = array<i32>} : memref<1x4x256xf32, #tpu.memory_space<vmem>>, vector<1x4x256xf32>,
    return
  }
  func.func @transform_0(%arg0: i32, %arg1: i32) -> (i32, i32, i32) {
    %c0_i32 = arith.constant 0 : i32
    %c0_i32_0 = arith.constant 0 : i32
    %c0_i32_1 = arith.constant 0 : i32
    %c0_i32_2 = arith.constant 0 : i32
    return %c0_i32, %c0_i32_0, %c0_i32_1 : i32, i32, i32
  }
  func.func @transform_1(%arg0: i32, %arg1: i32) -> (i32, i32, i32) {
    %c0_i32 = arith.constant 0 : i32
    %c0_i32_0 = arith.constant 0 : i32
    return %arg0, %c0_i32, %arg1 : i32, i32, i32
  }
  func.func @transform_2(%arg0: i32, %arg1: i32) -> (i32, i32, i32) {
    %c0_i32 = arith.constant 0 : i32
    %c0_i32_0 = arith.constant 0 : i32
    return %arg0, %c0_i32, %arg1 : i32, i32, i32
  }
  func.func @transform_3(%arg0: i32, %arg1: i32) -> (i32, i32, i32) {
    %c0_i32 = arith.constant 0 : i32
    %c0_i32_0 = arith.constant 0 : i32
    return %arg0, %c0_i32, %arg1 : i32, i32, i32
  }
}

</mosaic_0001>

<bundles_post_ra>
// kernel: noise_injection_forward.3
= control target key start
LH: loop header
LB: loop body
LE: loop exit
PB: predicated region body
PF: predicated region fallthrough
CT: control target
= control target key end

     0   :  { %s461_s14 = smov 0   ;;  %s463_s15 = smov 0   ;;  %s497_s0 = inlined_call_operand.<no memory space> [shape: f32[1,1,1], index: 0, kind: input, shape index: {}]   ;;  %s498_s1 = inlined_call_operand.vmem [shape: f32[2,4,256], index: 1, kind: input, shape index: {}]   ;;  %s499_s2 = inlined_call_operand.vmem [shape: f32[2,1,256], index: 2, kind: input, shape index: {}]   ;;  %s500_s3 = inlined_call_operand.vmem [shape: f32[2,4,256], index: 3, kind: output, shape index: {}]  }
   0x1   :  { %v8_v0 = vstv %s497_s0  ;;  %s465_s16 = smov 0  }
   0x2   :  { %9 = vst [vmem:[#allocation2] sm:$0x1] %v8_v0 }
   0x3 LB: > { %s27_s0 = sadd.s32 1, %s431_s15  ;;  %p377_p0 = scmp.ge.s32.totalorder %s435_s16, 1  ;;  %s435_s16 = sphi %s465_s16, %s15_s16   ;;  %s431_s15 = sphi %s463_s15, %s502_s15   ;;  %s427_s14 = sphi %s461_s14, %s501_s14  }
   0x4   : > { %p29_p1 = scmp.ge.s32.totalorder %s27_s0, 2  ;;  %p176_p2 = scmp.lt.s32.totalorder %s435_s16, 3 }
   0x6   : > { %s504_s0 = smov (%p29_p1, %s27_s0), 0  ;;  %p177_p3 = pnand %p377_p0, %p176_p2 }
   0x7   : > { %p217_p4 = scmp.lt.s32.totalorder (!%p177_p3), %s427_s14, 1 }
   0x8   : > { %180 = sbr.rel (%p177_p3) target bundleno = 150 (0x96), region = 32 }
   0xd   : > { %v246_v1 = vld [vmem:[#allocation2] sm:$0x1]  ;;  %v437_v2 = vmov 0   ;;  %v253_v3 = vlaneseq  ;;  %s506_s14 = smov (!%p217_p4, %s427_s14), 1 }
   0xe   : > { %412 = vset.pattern.permute.xlu0 %v437_v2  ;;  %s380_s17 = sshll.u32 %s506_s14, 1  ;;  %s385_s21 = sshll.u32 %s506_s14, 3 }
   0xf   : > { %250 = vperm.xlu0 %412, %v246_v1   ;;  %v254_v4 = vshrl.u32 %v253_v3, 7  ;;  %s233_s20 = scalar_lea.vmem %s499_s2, %s380_s17  ;;  %s224_s24 = scalar_lea.vmem %s498_s1, %s385_s21 }
  0x10   : > { %v247_v7 = vld [vmem:[%s233_s20] sm:$0x3]  ;;  %s243_s27 = scalar_lea.vmem %s500_s3, %s385_s21 }
  0x11   : > { %v255_v5 = vsub.s32 0, %v254_v4  ;;  %v265_v8 = vsub.s32 1, %v254_v4  ;;  %v245_v13 = vld [vmem:[%s224_s24] sm:$0xff] }
  0x8a   : > { %v251_v6 = vpop.permute.xlu0 %250 }
  0x8b   : > { %v256_v9 = vrot.slane %v251_v6, %v255_v5 }
  0x8d   : > { %v257_v10 = vmul.f32 %v256_v9, %v247_v7 }
  0x8f   : > { %v262_v11 = vrot.slane %v257_v10, %v255_v5  ;;  %v266_v12 = vrot.slane %v257_v10, %v265_v8 }
  0x91   : > { %v267_v14 = vcombine.low %v262_v11, %v266_v12 }
  0x93   : > { %v269_v15 = vadd.f32 %v267_v14, %v245_v13 }
  0x95   : > { %270 = vst [vmem:[%s243_s27] sm:$0xff] %v269_v15 }
  0x96 PF: > { %s15_s16 = sadd.s32 1, %s435_s16   ;;  %s501_s14 = smov %s431_s15 }
  0x97   : > { %p12_p5 = scmp.ge.s32.totalorder %s15_s16, 4   ;;  %s502_s15 = smov %s504_s0 }
  0x99   :  { %14 = sbr.rel (!%p12_p5) target bundleno = 3 (0x3), region = 65 }

// kernel: noise_injection_forward.2
= control target key start
LH: loop header
LB: loop body
LE: loop exit
PB: predicated region body
PF: predicated region fallthrough
CT: control target
= control target key end

     0   :  { %s133_s0 = inlined_call_operand.vmem [shape: f32[2,32], index: 0, kind: input, shape index: {}]   ;;  %s134_s1 = inlined_call_operand.vmem [shape: f32[1,32], index: 1, kind: input, shape index: {}]   ;;  %s135_s2 = inlined_call_operand.<no memory space> [shape: f32[1,1], index: 2, kind: input, shape index: {}]   ;;  %s136_s3 = inlined_call_operand.hbm [shape: f32[1,1], index: 3, kind: output, shape index: {}]  }
   0x1   :  { %v8_v0 = vstv %s135_s2 }
   0x2   :  { %9 = vst [vmem:[#allocation2] sm:$0x1] %v8_v0 }
   0x3   :  { %v17_v1 = vld [vmem:[%s133_s0] sm:$0x3] }
   0x4   :  { %v19_v2 = vmul.f32 0.044715, %v17_v1 }
   0x5   :  { %10 = vsyncpa [#allocation4], 0  ;;  %v18_v7 = vmul.f32 0.5, %v17_v1  ;;  %v73_v10 = vld [vmem:[%s134_s1] ss:$0 sm:$0xff]  ;;  %vm35_vm0 = vcmask 254976  }
   0x6   :  { %v20_v3 = vmul.f32 %v19_v2, %v17_v1  ;;  %vm47_vm1 = vcmask 1024   ;;  %s100_s0 = smov [#allocation3]   ;;  %vm57_vm2 = vcmask 0  }
   0x7   :  { %s65_s2 = sshll.u32 %s100_s0, 4  ;;  %s66_s2 = int_to_ptr.vmem [resolvable:$true] %s65_s2 }
   0x8   :  { %v21_v4 = vmul.f32 %v20_v3, %v17_v1  ;;  %s78_s1 = scalar_lea.vmem %s66_s2, 16  ;;  %s82_s18 = scalar_lea.vmem %s66_s2, 32 }
   0x9   :  { %v74_v14 = vld [vmem:[#allocation2] ss:$0 sm:$0xff]  ;;  %p79_p0 = scmp.ne.s32.totalorder %s66_s2, %s78_s1  ;;  %p83_p1 = scmp.lt.s32.totalorder %s66_s2, %s66_s2 }
   0xa   :  { %v22_v5 = vadd.f32 %v21_v4, %v17_v1  ;;  %p84_p2 = scmp.lt.s32.totalorder %s82_s18, %s78_s1 }
   0xc   :  { %v23_v6 = vmul.f32 0.7978846, %v22_v5  ;;  %p85_p3 = por %p84_p2, %p83_p1 }
   0xe   :  { %76 = vtanh.f32 %v23_v6  ;;  %p86_p4 = pnand %p85_p3, %p79_p0 }
  0x1b   :  { %v77_v8 = vpop.eup %76 }
  0x1c   :  { %v25_v9 = vadd.f32 1.0, %v77_v8 }
  0x1e   :  { %v26_v11 = vmul.f32 %v25_v9, %v18_v7 }
  0x20   :  { %v34_v12 = vmul.f32 %v73_v10, %v26_v11 }
  0x22   :  { %v36_v13 = vsel %vm35_vm0, %v34_v12, 0.0 }
  0x23   :  { %37 = vadd.xlane.f32.xlu0 %v36_v13 }
  0xac   :  { %v38_v15 = vpop.xlane.xlu0 %37 }
  0xad   :  { %v46_v16 = vadd.f32 %v74_v14, %v38_v15 }
  0xaf   :  { %v48_v17 = vsel %vm47_vm1, %v46_v16, 0.0 }
  0xb0   :  { %v49_v18 = vrot.slane %v48_v17, 4 }
  0xb2   :  { %v50_v19 = vadd.f32 %v49_v18, %v48_v17 }
  0xb4   :  { %v51_v20 = vrot.slane %v50_v19, 2 }
  0xb6   :  { %v52_v21 = vadd.f32 %v51_v20, %v50_v19 }
  0xb8   :  { %v53_v22 = vrot.slane %v52_v21, 1 }
  0xba   :  { %v54_v23 = vadd.f32 %v53_v22, %v52_v21 }
  0xbc   :  { %v56_v24 = vmul.f32 0.5, %v54_v23 }
  0xbe   :  { %58 = vst.msk [vmem:[#allocation3] sm:$0x1] %vm57_vm2, %v56_v24 }
  0xbf   :  { %89 = shalt.err (!%p86_p4)
}
  0xc0   :  { %68 = dma.vmem_to_hbm [thread:$0]  %s66_s2, 16, %s136_s3, [#allocation4]  }
  0xc1   :  { %98 = dma.done.wait [#allocation4], 16  }
  0xc2   :  { %99 = vsyncadd [#allocation4], 4294967280 }
  0xc3   :  { %72 = vsyncpa [#allocation4], 1 }

</bundles_post_ra>
